<compile_context>
chip_gen: v5e
topology: v5e:2x2
jax: 0.10.0
libtpu: 0.0.40
codegen_flags: <defaults>
</compile_context>

<pallas_src>
import functools

import jax
import jax.numpy as jnp
from jax.experimental import pallas as pl
from jax.experimental.pallas import tpu as pltpu

LANES = 128
SUBLANES = 8
TARGET_BLOCK_BYTES = 2 << 20      # ~2 MiB per input per pipeline buffer


def _default_num_cores():
    """2 partial sums only on chips exposing 2 TensorCores to one Pallas call
    (megacore: v4 / v5p / v7x). v2/v3/v5e/v6e see a single TC per device, where
    the extra 'parallel' slot is just a wasted serial step."""
    try:
        kind = jax.devices()[0].device_kind.lower()
    except Exception:
        return 1
    single_tc_markers = ("v2", "v3", "lite", "v5e", "v6e")
    if any(m in kind for m in single_tc_markers):
        return 1
    return 2


def _focal_loss_kernel(x_ref, t_ref, out_ref, acc_ref, *,
                       alpha, gamma, blocks_per_core,
                       full_blocks, tail_valid, has_tail, has_dummy):
    c = pl.program_id(0)   # core / partial-sum index ("parallel")
    i = pl.program_id(1)   # reduction step within this core ("arbitrary")

    @pl.when(i == 0)
    def _init():
        acc_ref[...] = jnp.zeros_like(acc_ref)

    # Stream native dtype, compute in f32 (required on v5e: no bf16 VPU/EUP).
    x = x_ref[...].astype(jnp.float32)   # logits
    t = t_ref[...].astype(jnp.float32)   # targets (expected {0,1})

    # Numerically stable binary_cross_entropy_with_logits (reduction='none'):
    #   bce = max(x,0) - x*t + log1p(exp(-|x|))
    e = jnp.exp(-jnp.abs(x))             # EUP #1
    log_term = jnp.log1p(e)              # EUP #2
    bce = jnp.maximum(x, 0.0) - x * t + log_term

    # pt = exp(-bce) reconstructed from e (exact for binary targets), so we pay
    # one cheap exact divide instead of a second exp:
    #   sigmoid(x) = 1/(1+e)           for x >= 0
    #              = 1 - 1/(1+e)       for x <  0
    #   pt = sigmoid(x) if t==1 else 1 - sigmoid(x)
    p = 1.0 / (1.0 + e)                  # exact divide (EUP), keeps rtol=1e-5
    x_pos = x >= 0.0
    t_pos = t >= 1.0                     # also implements alpha.gather(0, t.long())
    sig = jnp.where(x_pos, p, 1.0 - p)
    one_minus_pt = jnp.where(t_pos, 1.0 - sig, sig)

    at_bce = jnp.where(t_pos, 1.0 - alpha, alpha) * bce

    # (1 - pt) ** gamma, specialized for small non-negative integer gamma
    # (gamma == 2 -> a single multiply), avoiding a log+exp pair.
    g_f = float(gamma)
    if g_f == int(g_f) and 0.0 <= g_f <= 8.0:
        focal_w = None
        for _ in range(int(g_f)):
            focal_w = one_minus_pt if focal_w is None else focal_w * one_minus_pt
        f_loss = at_bce if focal_w is None else at_bce * focal_w
    else:
        f_loss = at_bce * jnp.power(jnp.maximum(one_minus_pt, 0.0),
                                    jnp.float32(g_f))

    def _accumulate(vals):
        # Leading-axis reduce onto the vreg-shaped accumulator: plain VPU adds.
        acc_ref[...] += vals.reshape(-1, SUBLANES, LANES).sum(axis=0)

    if has_tail or has_dummy:
        g = c * blocks_per_core + i      # global (unclamped) block index

        @pl.when(g < full_blocks)
        def _full_block():
            _accumulate(f_loss)

        if has_tail:
            @pl.when(g == full_blocks)
            def _tail_block():
                # Block-LOCAL flat index (< block_rows*128 <= 2^20), so int32
                # can never overflow regardless of total tensor size.
                row = jax.lax.broadcasted_iota(jnp.int32, f_loss.shape, 0)
                lane = jax.lax.broadcasted_iota(jnp.int32, f_loss.shape, 1)
                local = row * LANES + lane
                _accumulate(jnp.where(local < tail_valid, f_loss, 0.0))
        # g > full_blocks: dummy slot (clamped re-DMA) contributes nothing.
    else:
        _accumulate(f_loss)

    @pl.when(i == pl.num_programs(1) - 1)
    def _finalize():
        # Single cross-lane/sublane reduce per core; write raw partial sum.
        out_ref[...] = jnp.sum(acc_ref[...]).reshape(1, 1, 1)


def weighted_focal_loss(inputs, targets, alpha=0.25, gamma=2.0,
                        block_rows=None, num_cores=None):
    """Pallas TPU implementation of WeightedFocalLoss.forward.

    inputs, targets: arrays of identical shape (any rank). Returns scalar f32
    mean focal loss.

    Performance note: arrays stream in their NATIVE dtype and are upcast in
    VMEM -- pass bf16 logits and (especially) bf16 targets when possible
    (targets are {0,1}, so this is lossless) to halve HBM traffic. Do not
    pre-cast to f32 in the caller.
    """
    assert inputs.shape == targets.shape
    n_valid = int(inputs.size)
    if n_valid == 0:
        return jnp.float32(float("nan"))   # mean of empty tensor

    def _row_align(dt):
        # sublane packing: f32 -> 8 rows, bf16 -> 16, int8/fp8 -> 32
        return 8 * max(1, 4 // jnp.dtype(dt).itemsize)

    align_rows = max(_row_align(inputs.dtype), _row_align(targets.dtype))
    align_elems = align_rows * LANES

    x_flat = inputs.reshape(-1)
    t_flat = targets.reshape(-1)

    padded = pl.cdiv(n_valid, align_elems) * align_elems
    pad = padded - n_valid
    if pad:
        # Only the ragged tail (< one aligned row group) is padded; the padded
        # elements are masked out inside the kernel.
        x_flat = jnp.pad(x_flat, (0, pad))
        t_flat = jnp.pad(t_flat, (0, pad))

    rows = padded // LANES
    x2 = x_flat.reshape(rows, LANES)
    t2 = t_flat.reshape(rows, LANES)

    # Block size: ~TARGET_BLOCK_BYTES per input per buffer (4096 rows f32,
    # 8192 rows bf16), clamped to the array and aligned to the sublane packing.
    if block_rows is None:
        max_item = max(jnp.dtype(inputs.dtype).itemsize,
                       jnp.dtype(targets.dtype).itemsize)
        block_rows = TARGET_BLOCK_BYTES // (LANES * max_item)
    block_rows = min(int(block_rows), rows)
    block_rows = max(align_rows, (block_rows // align_rows) * align_rows)

    total_blocks = pl.cdiv(rows, block_rows)

    if num_cores is None:
        num_cores = _default_num_cores()
    num_cores = max(1, min(int(num_cores), int(total_blocks)))
    blocks_per_core = pl.cdiv(total_blocks, num_cores)

    # Tail handling: the last real block is "ragged" if it overhangs the row
    # count or contains wrapper padding. tail_valid is a compile-time count of
    # valid elements within that block (block-local, so no overflow concerns).
    has_tail = (rows % block_rows != 0) or (padded != n_valid)
    full_blocks = total_blocks - 1 if has_tail else total_blocks
    tail_valid = (n_valid - full_blocks * block_rows * LANES) if has_tail else 0
    has_dummy = num_cores * blocks_per_core > total_blocks

    kernel = functools.partial(
        _focal_loss_kernel,
        alpha=float(alpha), gamma=float(gamma),
        blocks_per_core=int(blocks_per_core),
        full_blocks=int(full_blocks), tail_valid=int(tail_valid),
        has_tail=bool(has_tail), has_dummy=bool(has_dummy))

    last_block = total_blocks - 1
    if has_dummy:
        def data_map(c, i):
            # Dummy slots clamp to the last real block (in-bounds DMA) and are
            # zeroed by skipping accumulation in-kernel.
            return (jnp.minimum(c * blocks_per_core + i, last_block), 0)
    else:
        def data_map(c, i):
            return (c * blocks_per_core + i, 0)

    x_spec = pl.BlockSpec((block_rows, LANES), data_map)
    t_spec = pl.BlockSpec((block_rows, LANES), data_map)

    # Raise the scoped-VMEM limit so large double-buffered blocks (and the f32
    # elementwise temporaries) fit on every generation (v5e default is 16 MiB;
    # v7x physical is 64 MiB, so cap well below that).
    io_bytes = 2 * block_rows * LANES * (x2.dtype.itemsize + t2.dtype.itemsize)
    f32_block_bytes = block_rows * LANES * 4
    vmem_limit = int(min(56 << 20, max(32 << 20, io_bytes + 8 * f32_block_bytes)))

    bytes_accessed = int(x2.size * x2.dtype.itemsize + t2.size * t2.dtype.itemsize)
    partials = pl.pallas_call(
        kernel,
        out_shape=jax.ShapeDtypeStruct((num_cores, 1, 1), jnp.float32),
        grid=(num_cores, blocks_per_core),
        in_specs=[x_spec, t_spec],
        out_specs=pl.BlockSpec((1, 1, 1), lambda c, i: (c, 0, 0)),
        scratch_shapes=[pltpu.VMEM((SUBLANES, LANES), jnp.float32)],
        compiler_params=pltpu.CompilerParams(
            dimension_semantics=("parallel", "arbitrary"),
            vmem_limit_bytes=vmem_limit),
        cost_estimate=pl.CostEstimate(
            flops=16 * n_valid,
            transcendentals=2 * n_valid,
            bytes_accessed=bytes_accessed),
    )(x2, t2)

    return jnp.sum(partials) / jnp.float32(n_valid)


def _reference(inputs, targets, alpha=0.25, gamma=2.0):
    x = inputs.astype(jnp.float32).reshape(-1)
    t = targets.astype(jnp.float32).reshape(-1)
    bce = jnp.maximum(x, 0.0) - x * t + jnp.log1p(jnp.exp(-jnp.abs(x)))
    at = jnp.where(t >= 1.0, 1.0 - alpha, alpha)   # alpha[targets.long()]
    pt = jnp.exp(-bce)
    return jnp.mean(at * (1.0 - pt) ** gamma * bce)


if __name__ == "__main__":
    key = jax.random.PRNGKey(0)
    k1, k2, k3, k4, k5, k6 = jax.random.split(key, 6)

    # Segmentation-style logits/targets: (B, C, H, W)
    inputs = jax.random.normal(k1, (2, 4, 16, 16), dtype=jnp.float32)
    targets = (jax.random.uniform(k2, (2, 4, 16, 16)) > 0.5).astype(jnp.float32)

    loss = jax.block_until_ready(
        weighted_focal_loss(inputs, targets, alpha=0.25, gamma=2.0))
    ref = _reference(inputs, targets, alpha=0.25, gamma=2.0)
    assert jnp.allclose(loss, ref, rtol=1e-5, atol=1e-6), (loss, ref)

    # Odd (non-128-multiple) size: exercises the padded / masked tail path.
    x_odd = jax.random.normal(k3, (3, 5, 7, 11), dtype=jnp.float32)
    t_odd = (jax.random.uniform(k4, (3, 5, 7, 11)) > 0.5).astype(jnp.float32)
    loss_odd = jax.block_until_ready(weighted_focal_loss(x_odd, t_odd))
    ref_odd = _reference(x_odd, t_odd)
    assert jnp.allclose(loss_odd, ref_odd, rtol=1e-5, atol=1e-6), (loss_odd, ref_odd)

    # Small block size: exercises a multi-block grid / multi-core split.
    loss_mb = jax.block_until_ready(
        weighted_focal_loss(inputs, targets, block_rows=8))
    assert jnp.allclose(loss_mb, ref, rtol=1e-5, atol=1e-6), (loss_mb, ref)

    # bf16 targets (lossless {0,1}): exercises mixed-dtype native streaming.
    loss_bf = jax.block_until_ready(
        weighted_focal_loss(inputs, targets.astype(jnp.bfloat16)))
    assert jnp.allclose(loss_bf, ref, rtol=1e-5, atol=1e-6), (loss_bf, ref)

    # Larger input: exercises the default 4096-row blocks, block-overhang tail
    # masking, and (on megacore chips) the dummy-slot path.
    x_big = jax.random.normal(k5, (2, 4, 384, 384), dtype=jnp.float32)
    t_big = (jax.random.uniform(k6, (2, 4, 384, 384)) > 0.5).astype(jnp.float32)
    loss_big = jax.block_until_ready(weighted_focal_loss(x_big, t_big))
    ref_big = _reference(x_big, t_big)
    assert jnp.allclose(loss_big, ref_big, rtol=1e-5, atol=1e-6), (loss_big, ref_big)

    print("KERNEL_OK")
</pallas_src>

<mosaic_0001>
module attributes {stable_mosaic.version = 11 : i64} {
  func.func @_focal_loss_kernel(%arg0: i32, %arg1: i32, %arg2: memref<16x128xf32, #tpu.memory_space<vmem>>, %arg3: memref<16x128xf32, #tpu.memory_space<vmem>>, %arg4: memref<1x1x1xf32, #tpu.memory_space<vmem>>, %arg5: memref<8x128xf32, #tpu.memory_space<vmem>>) attributes {dimension_semantics = [#tpu.dimension_semantics<parallel>, #tpu.dimension_semantics<arbitrary>], iteration_bounds = array<i64: 1, 1>, scalar_prefetch = 0 : i64, scratch_operands = 1 : i64, tpu.core_type = #tpu.core_type<tc>, window_params = [{transform_indices = @transform_0, window_bounds = array<i64: 16, 128>}, {transform_indices = @transform_1, window_bounds = array<i64: 16, 128>}, {transform_indices = @transform_2, window_bounds = array<i64: 1, 1, 1>}]} {
    %c0_i32 = arith.constant 0 : i32
    %0 = arith.cmpi eq, %arg1, %c0_i32 : i32
    %1 = arith.extui %0 : i1 to i32
    %c0_i32_0 = arith.constant 0 : i32
    %2 = arith.cmpi ne, %1, %c0_i32_0 : i32
    scf.if %2 {
      %cst_20 = arith.constant 0.000000e+00 : f32
      %43 = vector.broadcast %cst_20 : f32 to vector<8x128xf32>
      %c0_21 = arith.constant 0 : index
      %c0_22 = arith.constant 0 : index
      %44 = vector.load %arg5[%c0_21, %c0_22] : memref<8x128xf32, #tpu.memory_space<vmem>>, vector<8x128xf32>
      tpu.vector_store %arg5[%c0_21, %c0_22], %43 {strides = array<i32>} : memref<8x128xf32, #tpu.memory_space<vmem>>, vector<8x128xf32>,
    } else {
    }
    %c0 = arith.constant 0 : index
    %c0_1 = arith.constant 0 : index
    %3 = vector.load %arg2[%c0, %c0_1] : memref<16x128xf32, #tpu.memory_space<vmem>>, vector<16x128xf32>
    %c0_2 = arith.constant 0 : index
    %c0_3 = arith.constant 0 : index
    %4 = vector.load %arg3[%c0_2, %c0_3] : memref<16x128xf32, #tpu.memory_space<vmem>>, vector<16x128xf32>
    %5 = math.absf %3 : vector<16x128xf32>
    %cst = arith.constant 0.000000e+00 : f32
    %6 = vector.broadcast %cst : f32 to vector<16x128xf32>
    %7 = arith.subf %6, %5 : vector<16x128xf32>
    %8 = math.exp %7 : vector<16x128xf32>
    %9 = math.log1p %8 : vector<16x128xf32>
    %cst_4 = arith.constant 0.000000e+00 : f32
    %10 = vector.broadcast %cst_4 : f32 to vector<16x128xf32>
    %11 = arith.maximumf %3, %10 : vector<16x128xf32>
    %12 = arith.mulf %3, %4 : vector<16x128xf32>
    %13 = arith.subf %11, %12 : vector<16x128xf32>
    %14 = arith.addf %13, %9 : vector<16x128xf32>
    %cst_5 = arith.constant 1.000000e+00 : f32
    %15 = vector.broadcast %cst_5 : f32 to vector<16x128xf32>
    %16 = arith.addf %15, %8 : vector<16x128xf32>
    %cst_6 = arith.constant 1.000000e+00 : f32
    %17 = vector.broadcast %cst_6 : f32 to vector<16x128xf32>
    %18 = arith.divf %17, %16 : vector<16x128xf32>
    %cst_7 = arith.constant 0.000000e+00 : f32
    %19 = vector.broadcast %cst_7 : f32 to vector<16x128xf32>
    %20 = arith.cmpf oge, %3, %19 : vector<16x128xf32>
    %cst_8 = arith.constant 1.000000e+00 : f32
    %21 = vector.broadcast %cst_8 : f32 to vector<16x128xf32>
    %22 = arith.cmpf oge, %4, %21 : vector<16x128xf32>
    %cst_9 = arith.constant 1.000000e+00 : f32
    %23 = vector.broadcast %cst_9 : f32 to vector<16x128xf32>
    %24 = arith.subf %23, %18 : vector<16x128xf32>
    %25 = arith.select %20, %18, %24 : vector<16x128xi1>, vector<16x128xf32>
    %cst_10 = arith.constant 1.000000e+00 : f32
    %26 = vector.broadcast %cst_10 : f32 to vector<16x128xf32>
    %27 = arith.subf %26, %25 : vector<16x128xf32>
    %28 = arith.select %22, %27, %25 : vector<16x128xi1>, vector<16x128xf32>
    %cst_11 = arith.constant 7.500000e-01 : f32
    %cst_12 = arith.constant 2.500000e-01 : f32
    %29 = vector.broadcast %cst_11 : f32 to vector<16x128xf32>
    %30 = vector.broadcast %cst_12 : f32 to vector<16x128xf32>
    %31 = arith.select %22, %29, %30 : vector<16x128xi1>, vector<16x128xf32>
    %32 = arith.mulf %31, %14 : vector<16x128xf32>
    %33 = arith.mulf %28, %28 : vector<16x128xf32>
    %34 = arith.mulf %32, %33 : vector<16x128xf32>
    %c0_13 = arith.constant 0 : index
    %c0_14 = arith.constant 0 : index
    %35 = vector.load %arg5[%c0_13, %c0_14] : memref<8x128xf32, #tpu.memory_space<vmem>>, vector<8x128xf32>
    %36 = vector.shape_cast %34 : vector<16x128xf32> to vector<2x8x128xf32>
    %cst_15 = arith.constant dense<0.000000e+00> : vector<8x128xf32>
    %37 = vector.multi_reduction <add>, %36, %cst_15 [0] : vector<2x8x128xf32> to vector<8x128xf32>
    %38 = arith.addf %35, %37 : vector<8x128xf32>
    %c0_16 = arith.constant 0 : index
    %c0_17 = arith.constant 0 : index
    %39 = vector.load %arg5[%c0_16, %c0_17] : memref<8x128xf32, #tpu.memory_space<vmem>>, vector<8x128xf32>
    tpu.vector_store %arg5[%c0_16, %c0_17], %38 {strides = array<i32>} : memref<8x128xf32, #tpu.memory_space<vmem>>, vector<8x128xf32>,
    %c0_i32_18 = arith.constant 0 : i32
    %40 = arith.cmpi eq, %arg1, %c0_i32_18 : i32
    %41 = arith.extui %40 : i1 to i32
    %c0_i32_19 = arith.constant 0 : i32
    %42 = arith.cmpi ne, %41, %c0_i32_19 : i32
    scf.if %42 {
      %c0_20 = arith.constant 0 : index
      %c0_21 = arith.constant 0 : index
      %43 = vector.load %arg5[%c0_20, %c0_21] : memref<8x128xf32, #tpu.memory_space<vmem>>, vector<8x128xf32>
      %44 = vector.shape_cast %43 : vector<8x128xf32> to vector<1x8x128xf32>
      %cst_22 = arith.constant dense<0.000000e+00> : vector<1xf32>
      %45 = vector.multi_reduction <add>, %44, %cst_22 [1, 2] : vector<1x8x128xf32> to vector<1xf32>
      %46 = vector.shape_cast %45 : vector<1xf32> to vector<1x1x1xf32>
      %47 = vector.extract %46[0, 0, 0] : f32 from vector<1x1x1xf32>
      %48 = vector.broadcast %47 : f32 to vector<1x1x1xf32>
      %c0_23 = arith.constant 0 : index
      %c0_24 = arith.constant 0 : index
      %c0_25 = arith.constant 0 : index
      %49 = vector.load %arg4[%c0_23, %c0_24, %c0_25] : memref<1x1x1xf32, #tpu.memory_space<vmem>>, vector<1x1x1xf32>
      tpu.vector_store %arg4[%c0_23, %c0_24, %c0_25], %48 {strides = array<i32>} : memref<1x1x1xf32, #tpu.memory_space<vmem>>, vector<1x1x1xf32>,
    } else {
    }
    return
  }
  func.func @transform_0(%arg0: i32, %arg1: i32) -> (i32, i32) {
    %c1_i32 = arith.constant 1 : i32
    %0 = arith.muli %arg0, %c1_i32 : i32
    %1 = arith.addi %0, %arg1 : i32
    %c0_i32 = arith.constant 0 : i32
    %c0_i32_0 = arith.constant 0 : i32
    return %1, %c0_i32 : i32, i32
  }
  func.func @transform_1(%arg0: i32, %arg1: i32) -> (i32, i32) {
    %c1_i32 = arith.constant 1 : i32
    %0 = arith.muli %arg0, %c1_i32 : i32
    %1 = arith.addi %0, %arg1 : i32
    %c0_i32 = arith.constant 0 : i32
    %c0_i32_0 = arith.constant 0 : i32
    return %1, %c0_i32 : i32, i32
  }
  func.func @transform_2(%arg0: i32, %arg1: i32) -> (i32, i32, i32) {
    %c0_i32 = arith.constant 0 : i32
    %c0_i32_0 = arith.constant 0 : i32
    %c0_i32_1 = arith.constant 0 : i32
    return %arg0, %c0_i32, %c0_i32_0 : i32, i32, i32
  }
}

</mosaic_0001>

<bundles_post_ra>
// kernel: tpu_custom_call.1
= control target key start
LH: loop header
LB: loop body
LE: loop exit
PB: predicated region body
PF: predicated region fallthrough
CT: control target
= control target key end

     0   :  { %7 = vsyncpa [#allocation4], 0  ;;  %s365_s0 = inlined_call_operand.hbm [shape: f32[16,128], index: 0, kind: input, shape index: {}]   ;;  %s366_s1 = inlined_call_operand.hbm [shape: f32[16,128], index: 1, kind: input, shape index: {}]   ;;  %s367_s2 = inlined_call_operand.hbm [shape: f32[1,1,1], index: 2, kind: output, shape index: {}]  }
   0x1   :  { %8 = vsyncpa [#allocation7], 0 }
   0x2   :  { %9 = vsyncpa [#allocation5], 0  ;;  %s18_s11 = sshll.u32 %s365_s0, 4  ;;  %s287_s12 = smov [#allocation3]   ;;  %s19_s11 = int_to_ptr.hbm [resolvable:$true] %s18_s11 }
   0x3   :  { %s20_s13 = sshll.u32 %s287_s12, 4  ;;  %s35_s16 = sshll.u32 %s366_s1, 4  ;;  %s21_s13 = int_to_ptr.vmem [resolvable:$true] %s20_s13  ;;  %s36_s16 = int_to_ptr.hbm [resolvable:$true] %s35_s16 }
   0x4   :  { %s288_s17 = smov 128   ;;  %s289_s18 = smov 8  }
   0x5   :  { %26 = dma.hbm_to_vmem [thread:$0]  %s19_s11, 256, %s21_s13, [#allocation4], %s288_s17, %s288_s17, %s289_s18  }
   0x6   :  { %s290_s19 = smov [#allocation6]  }
   0x7   :  { %s37_s20 = sshll.u32 %s290_s19, 4  ;;  %s38_s20 = int_to_ptr.vmem [resolvable:$true] %s37_s20 }
   0x8   :  { %43 = dma.hbm_to_vmem [thread:$0]  %s36_s16, 256, %s38_s20, [#allocation7], %s288_s17, %s288_s17, %s289_s18  }
   0x9   :  { %281 = dma.done.wait [#allocation4], 256  }
   0xa   :  { %282 = vsyncadd [#allocation4], 4294967040 }
   0xb   :  { %283 = dma.done.wait [#allocation7], 256  }
   0xc   :  { %284 = vsyncadd [#allocation7], 4294967040  ;;  %v314_v0 = vld [vmem:[#allocation3] sm:$0xff]  ;;  %v316_v1 = vld [vmem:[#allocation3 + $0x8] sm:$0xff]  ;;  %v291_v61 = vmov 0.25   ;;  %s292_s0 = smov [#allocation8]  }
   0xd   :  { %v65_v2 = vand.u32 2147483647, %v314_v0  ;;  %v66_v3 = vand.u32 2147483647, %v316_v1  ;;  %v320_v13 = vld [vmem:[#allocation6] sm:$0xff]  ;;  %v322_v14 = vld [vmem:[#allocation6 + $0x8] sm:$0xff] }
   0xe   :  { %v91_v18 = vmax.f32 %v314_v0, 0.0  ;;  %v92_v21 = vmax.f32 %v316_v1, 0.0  ;;  %v93_v22 = vmul.f32 %v320_v13, %v314_v0  ;;  %v94_v23 = vmul.f32 %v322_v14, %v316_v1  ;;  %s176_s1 = sshll.u32 %s292_s0, 4  ;;  %s178_s23 = sshll.u32 %s367_s2, 4  ;;  %s177_s1 = int_to_ptr.vmem [resolvable:$true] %s176_s1  ;;  %s179_s23 = int_to_ptr.hbm [resolvable:$true] %s178_s23 }
   0xf   :  { %v67_v4 = vsub.f32 0.0, %v65_v2  ;;  %v68_v5 = vsub.f32 0.0, %v66_v3  ;;  %vm133_vm10 = vcmp.ge.f32.partialorder %v320_v13, 1.0  ;;  %vm131_vm11 = vcmp.ge.f32.partialorder %v314_v0, 0.0 }
  0x10   :  { %v95_v46 = vsub.f32 %v91_v18, %v93_v22  ;;  %v96_v50 = vsub.f32 %v92_v21, %v94_v23  ;;  %vm134_vm12 = vcmp.ge.f32.partialorder %v322_v14, 1.0  ;;  %vm132_vm13 = vcmp.ge.f32.partialorder %v316_v1, 0.0 }
  0x11   :  { %v69_v6 = vmul.f32 1.442695, %v67_v4  ;;  %v71_v7 = vmul.f32 1.442695, %v68_v5  ;;  %v143_v62 = vsel %vm133_vm10, 0.75, %v291_v61  ;;  %v144_v2 = vsel %vm134_vm12, 0.75, %v291_v61 }
  0x12   :  { %vm169_vm14 = vcmask 0  }
  0x13   :  { %197 = vpow2.f32 %v69_v6 }
  0x14   :  { %199 = vpow2.f32 %v71_v7 }
  0x19   :  { %v198_v8 = vpop.eup %197 }
  0x1a   :  { %v200_v9 = vpop.eup %199  ;;  %v73_v10 = vadd.f32 1.0, %v198_v8  ;;  %v76_v12 = vmul.f32 -0.5, %v198_v8  ;;  %v79_v20 = vand.u32 2147483647, %v198_v8 }
  0x1b   :  { %v82_v11 = vadd.f32 1.0, %v200_v9  ;;  %v85_v15 = vmul.f32 -0.5, %v200_v9  ;;  %v88_v26 = vand.u32 2147483647, %v200_v9 }
  0x1c   :  { %201 = vlog2.f32 %v73_v10  ;;  %v77_v16 = vadd.f32 1.0, %v76_v12  ;;  %vm106_vm0 = vweird.f32 %v73_v10  ;;  %v110_v30 = vand.u32 2147483647, %v73_v10 }
  0x1d   :  { %203 = vrcp.f32 %v73_v10  ;;  %v86_v25 = vadd.f32 1.0, %v85_v15  ;;  %v112_v31 = vand.u32 2147483648, %v73_v10  ;;  %vm121_vm2 = vweird.f32 %v82_v11 }
  0x1e   :  { %205 = vrcp.f32 %v82_v11  ;;  %v78_v29 = vmul.f32 %v198_v8, %v77_v16  ;;  %v127_v34 = vand.u32 2147483648, %v82_v11  ;;  %v125_v37 = vand.u32 2147483647, %v82_v11 }
  0x1f   :  { %207 = vlog2.f32 %v82_v11  ;;  %vm330_vm4 = vcmp.lt.f32.partialorder %v79_v20, 0.0004427343  ;;  %v87_v40 = vmul.f32 %v200_v9, %v86_v25  ;;  %vm334_vm5 = vcmp.lt.f32.partialorder %v88_v26, 0.0004427343 }
  0x20   :  { %v113_v44 = vor.u32 1.1754944e-38, %v112_v31  ;;  %vm111_vm7 = vcmp.eq.f32.partialorder %v110_v30, 8.507059e+37  ;;  %v128_v48 = vor.u32 1.1754944e-38, %v127_v34  ;;  %vm126_vm9 = vcmp.eq.f32.partialorder %v125_v37, 8.507059e+37 }
  0x22   :  { %v202_v17 = vpop.eup %201 }
  0x23   :  { %v204_v19 = vpop.eup %203  ;;  %v75_v35 = vmul.f32 0.6931472, %v202_v17 }
  0x24   :  { %v206_v24 = vpop.eup %205  ;;  %v102_v27 = vmul.f32 %v204_v19, %v73_v10  ;;  %vm107_vm1 = vweird.f32 %v204_v19 }
  0x25   :  { %v208_v28 = vpop.eup %207  ;;  %v117_v32 = vmul.f32 %v206_v24, %v82_v11  ;;  %vm122_vm3 = vweird.f32 %v206_v24  ;;  %vm339_vm6 = vmor %vm106_vm0, %vm107_vm1  ;;  %v81_v49 = vsel %vm330_vm4, %v78_v29, %v75_v35 }
  0x26   :  { %v103_v33 = vsub.f32 1.0, %v102_v27  ;;  %v84_v39 = vmul.f32 0.6931472, %v208_v28  ;;  %vm123_vm8 = vmor %vm121_vm2, %vm122_vm3  ;;  %v97_v56 = vadd.f32 %v95_v46, %v81_v49 }
  0x27   :  { %v118_v36 = vsub.f32 1.0, %v117_v32 }
  0x28   :  { %v104_v41 = vmul.f32 %v204_v19, %v103_v33  ;;  %v90_v52 = vsel %vm334_vm5, %v87_v40, %v84_v39  ;;  %v145_v5 = vmul.f32 %v143_v62, %v97_v56 }
  0x29   :  { %v119_v45 = vmul.f32 %v206_v24, %v118_v36  ;;  %v98_v59 = vadd.f32 %v96_v50, %v90_v52 }
  0x2a   :  { %v105_v47 = vadd.f32 %v204_v19, %v104_v41 }
  0x2b   :  { %v120_v51 = vadd.f32 %v206_v24, %v119_v45  ;;  %v146_v7 = vmul.f32 %v144_v2, %v98_v59 }
  0x2c   :  { %v109_v53 = vsel %vm339_vm6, %v204_v19, %v105_v47 }
  0x2d   :  { %v114_v54 = vsel %vm111_vm7, %v113_v44, %v109_v53  ;;  %v124_v55 = vsel %vm123_vm8, %v206_v24, %v120_v51 }
  0x2e   :  { %v129_v57 = vsel %vm126_vm9, %v128_v48, %v124_v55  ;;  %v135_v58 = vsub.f32 1.0, %v114_v54 }
  0x2f   :  { %v136_v60 = vsub.f32 1.0, %v129_v57 }
  0x30   :  { %v137_v63 = vsel %vm131_vm11, %v114_v54, %v135_v58 }
  0x31   :  { %v138_v3 = vsel %vm132_vm13, %v129_v57, %v136_v60  ;;  %v139_v4 = vsub.f32 1.0, %v137_v63 }
  0x32   :  { %v140_v0 = vsub.f32 1.0, %v138_v3 }
  0x33   :  { %v141_v6 = vsel %vm133_vm10, %v139_v4, %v137_v63 }
  0x34   :  { %v142_v1 = vsel %vm134_vm12, %v140_v0, %v138_v3  ;;  %v147_v8 = vmul.f32 %v141_v6, %v141_v6 }
  0x35   :  { %v148_v9 = vmul.f32 %v142_v1, %v142_v1 }
  0x36   :  { %v149_v10 = vmul.f32 %v147_v8, %v145_v5 }
  0x37   :  { %v150_v11 = vmul.f32 %v148_v9, %v146_v7 }
  0x39   :  { %v152_v12 = vadd.f32 %v150_v11, %v149_v10 }
  0x3b   :  { %159 = vadd.xlane.f32.xlu0 %v152_v12 }
  0xae   :  { %v160_v15 = vpop.xlane.xlu0 %159 }
  0xaf   :  { %v161_v16 = vrot.slane %v160_v15, 4 }
  0xb1   :  { %v162_v17 = vadd.f32 %v161_v16, %v160_v15 }
  0xb3   :  { %v163_v18 = vrot.slane %v162_v17, 2 }
  0xb5   :  { %v164_v19 = vadd.f32 %v163_v18, %v162_v17 }
  0xb7   :  { %v165_v20 = vrot.slane %v164_v19, 1 }
  0xb9   :  { %v166_v21 = vadd.f32 %v165_v20, %v164_v19 }
  0xbb   :  { %189 = vpush %v166_v21 }
  0xec   :  { %s190_s24 = spop %189 }
  0xed   :  { %v168_v13 = vstv %s190_s24 }
  0xee   :  { %170 = vst.msk [vmem:[#allocation8] sm:$0x1] %vm169_vm14, %v168_v13 }
  0xef   :  { %181 = dma.vmem_to_hbm [thread:$0]  %s177_s1, 16, %s179_s23, [#allocation5]  }
  0xf0   :  { %285 = dma.done.wait [#allocation5], 16  }
  0xf1   :  { %286 = vsyncadd [#allocation5], 4294967280 }
  0xf2   :  { %186 = vsyncpa [#allocation4], 1 }
  0xf3   :  { %187 = vsyncpa [#allocation7], 1 }
  0xf4   :  { %188 = vsyncpa [#allocation5], 1 }

</bundles_post_ra>
